<compile_context>
chip_gen: v5e
topology: v5e:2x2
jax: 0.10.0
libtpu: 0.0.40
codegen_flags: <defaults>
</compile_context>

<pallas_src>
import numpy as np
import jax
import jax.numpy as jnp
from jax.experimental import pallas as pl
from jax.experimental.pallas import tpu as pltpu


_NUM_PARAM_COLS = 8   # packed per-actuator constants, padded to 8 columns
_TILE_A = 8           # sublane tile over the actuator axis
_MAX_BLOCK_BYTES = 8 << 20  # per-buffer ceiling for the (tile_a, tile_p) block


def _round_up(x, m):
    return ((x + m - 1) // m) * m


def _arccos_poly(x):
    # Minimax approximation (Abramowitz & Stegun 4.4.45), |err| <= 6.8e-5 on
    # [0, 1]; reflected for negative arguments.  One EUP sqrt + short FMA chain.
    ax = jnp.abs(x)
    s = jnp.sqrt(jnp.maximum(1.0 - ax, 0.0))
    p = s * (1.5707288
             + ax * (-0.2121144
                     + ax * (0.0742610
                             + ax * (-0.0187293))))
    return jnp.where(x >= 0.0, p, jnp.float32(np.pi) - p)


def actuator_array_kernel(par_ref, pos_ref, out_ref):
    pos = pos_ref[...]        # (tile_a, tile_p)  motor-position tile
    par = par_ref[...]        # (tile_a, 8)       packed per-actuator constants

    s     = par[:, 0:1]       # inv_increment * sqrt(inv_c2)
    t     = par[:, 1:2]       # initial_stroke_length * sqrt(inv_c2)
    a     = par[:, 2:3]       # (offset^2 + pivot^2) * inv_c2
    base  = par[:, 3:4]       # initial_angle + sign * phi0   (phi0 hoisted)
    sign  = par[:, 4:5]       # +1 clockwise, -1 counter-clockwise
    ideal = par[:, 5:6]       # 1.0 => IdealActuator, 0.0 => LinearActuator

    # x = (sum_sq - stroke^2) / (2*off*piv), with the scale folded into s, t, a.
    u = pos * s + t
    x = jnp.clip(a - u * u, -1.0, 1.0)   # guard fp32 drift outside [-1, 1]
    phi = _arccos_poly(x)
    # angle = initial_angle + sign * (phi0 - phi) = base - sign * phi
    linear_angle = base - sign * phi
    # IdealActuator passes the motor position straight through (true select;
    # linear params on ideal / padded rows were sanitized in the wrapper).
    out_ref[...] = jnp.where(ideal > 0.5, pos, linear_angle)


def _pack_params(params, a_pad):
    """Build the (a_pad, 8) per-actuator constant block (O(A) work, once)."""
    increment, isl, off, piv, ang0, cw, ideal = [
        jnp.asarray(p, jnp.float32).reshape(-1) for p in params]
    a = increment.shape[0]
    pad_n = a_pad - a
    if pad_n:
        zpad = jnp.zeros((pad_n,), jnp.float32)
        increment = jnp.concatenate([increment, zpad])
        isl = jnp.concatenate([isl, zpad])
        off = jnp.concatenate([off, zpad])
        piv = jnp.concatenate([piv, zpad])
        ang0 = jnp.concatenate([ang0, zpad])
        cw = jnp.concatenate([cw, zpad])
        ideal = jnp.concatenate([ideal, jnp.ones((pad_n,), jnp.float32)])

    # Sanitize degenerate parameters (ideal / padded rows) so the untaken
    # linear branch stays finite.
    safe_inc = jnp.where(increment != 0.0, increment, 1.0)
    c2 = 2.0 * off * piv
    safe_c2 = jnp.where(c2 > 0.0, c2, 1.0)

    inv_inc = 1.0 / safe_inc
    inv_c2 = 1.0 / safe_c2
    sqrt_inv_c2 = jnp.sqrt(inv_c2)
    sum_sq = off * off + piv * piv

    s_col = inv_inc * sqrt_inv_c2
    t_col = isl * sqrt_inv_c2
    a_col = sum_sq * inv_c2

    # phi0 = phi at motor position 0  (stroke(0) = initial_stroke_length)
    x0 = jnp.clip((sum_sq - isl * isl) * inv_c2, -1.0, 1.0)
    phi0 = jnp.arccos(x0)

    sign = jnp.where(cw > 0.5, 1.0, -1.0).astype(jnp.float32)
    base = ang0 + sign * phi0

    pad = jnp.zeros_like(ideal)
    return jnp.stack([s_col, t_col, a_col, base, sign, ideal, pad, pad], axis=1)


def _vmem_budgets():
    """Per-generation VMEM limit + buffer budget (v5e/v6e: 128 MiB physical,
    v7x: 64 MiB per TensorCore)."""
    try:
        info = pltpu.get_tpu_info()
        phys = int(getattr(info, "vmem_capacity_bytes", 0)) or (64 << 20)
    except Exception:  # off-TPU tracing / API variance: fall back conservatively
        phys = 64 << 20
    vmem_limit = min(int(phys * 0.75), 96 << 20)      # 96 MiB on v5e/v6e, 48 MiB on v7x
    buffer_budget = int(vmem_limit * 0.8)             # leave headroom for params/scratch
    return vmem_limit, buffer_budget


def _choose_tile_p(tile_a, P, buffer_budget):
    """Largest lane tile (multiple of 128) such that pos+out double-buffers
    (4 x tile_a x tile_p x 4B) fit the budget, capped at 8 MiB per buffer, and
    bounded so the grid keeps >=2 (preferably >=4) steps when P is large."""
    per_buffer_cap = max(128 * tile_a * 4, min(buffer_budget // 4, _MAX_BLOCK_BYTES))
    tile = max(128, (per_buffer_cap // (tile_a * 4) // 128) * 128)

    p128 = _round_up(P, 128)
    tile = min(tile, p128)
    if p128 >= 2 * 128:                      # keep >= 2 grid steps (pipelining + megacore)
        tile = min(tile, max(128, (p128 // 2 // 128) * 128))
    if p128 >= 4 * 1024:                     # large P: prefer >= 4 steps, tiles stay >= 1024 lanes
        tile = min(tile, max(1024, (p128 // 4 // 128) * 128))
    return tile


def actuator_array_forward(motor_positions, params, *, tile_p=None):
    """motor_positions: (A, P) f32; params: 7 arrays of shape (A,):
    increment, initial_stroke_length, offset, pivot_radius, initial_angle,
    clockwise_axis_movement flag, ideal-actuator flag."""
    motor_positions = jnp.asarray(motor_positions, jnp.float32)
    A, P = motor_positions.shape

    vmem_limit, buffer_budget = _vmem_budgets()
    if tile_p is None:
        tile_p = _choose_tile_p(_TILE_A, P, buffer_budget)

    a_pad = _round_up(max(A, _TILE_A), _TILE_A)
    p_pad = _round_up(P, tile_p)

    packed = _pack_params(params, a_pad)
    if (a_pad, p_pad) != (A, P):
        motor_positions = jnp.pad(motor_positions,
                                  ((0, a_pad - A), (0, p_pad - P)))

    par_spec = pl.BlockSpec((_TILE_A, _NUM_PARAM_COLS), lambda i, j: (i, 0))
    pos_spec = pl.BlockSpec((_TILE_A, tile_p), lambda i, j: (i, j))
    # TODO(synk): on v5e, if profiling shows exposed DMA after the arccos
    # simplification, try pipeline_mode=pl.Buffered(3) on pos_spec.

    out = pl.pallas_call(
        actuator_array_kernel,
        out_shape=jax.ShapeDtypeStruct((a_pad, p_pad), jnp.float32),
        grid=(a_pad // _TILE_A, p_pad // tile_p),
        in_specs=[par_spec, pos_spec],
        out_specs=pos_spec,
        compiler_params=pltpu.CompilerParams(
            dimension_semantics=("parallel", "parallel"),
            vmem_limit_bytes=vmem_limit),
    )(packed, motor_positions)

    if (a_pad, p_pad) != (A, P):
        out = out[:A, :P]
    return out


def reference_forward(pos, params):
    inc, isl, off, piv, ang0, cw, ideal = [np.asarray(p, np.float64)[:, None]
                                           for p in params]
    pos = np.asarray(pos, np.float64)

    def steps_to_phi(p):
        stroke = p / inc + isl
        return np.arccos((off * off + piv * piv - stroke * stroke)
                         / (2.0 * off * piv))

    phi = steps_to_phi(pos)
    phi0 = steps_to_phi(np.zeros_like(pos))
    delta = phi0 - phi
    lin = np.where(cw > 0.5, ang0 + delta, ang0 - delta)
    return np.where(ideal > 0.5, pos, lin)


if __name__ == "__main__":
    A, P = 8, 256  # 8 actuators (6 linear + 2 ideal), 256 motor positions each

    # Deterministic per-actuator parameters (shapes from the module __init__:
    # one scalar per actuator for increment, initial_stroke_length, offset,
    # pivot_radius, initial_angle, plus clockwise flag and type flag).
    idx = np.arange(A, dtype=np.float32)
    increment = 154166.666 + 1000.0 * idx
    initial_stroke_length = 0.075 + 0.001 * idx
    offset = 0.34 + 0.002 * idx
    pivot_radius = 0.3204 + 0.002 * idx
    initial_angle = -0.005 + 0.001 * idx
    clockwise = (idx.astype(np.int32) % 2).astype(np.float32)
    ideal_flag = (idx >= 6).astype(np.float32)  # last two are IdealActuators
    params = tuple(jnp.asarray(p, jnp.float32) for p in (
        increment, initial_stroke_length, offset, pivot_radius,
        initial_angle, clockwise, ideal_flag))

    key = jax.random.PRNGKey(0)
    motor_positions = jax.random.uniform(
        key, (A, P), dtype=jnp.float32, minval=0.0, maxval=60000.0)

    out = actuator_array_forward(motor_positions, params)
    out = jax.block_until_ready(out)

    ref = reference_forward(np.asarray(motor_positions),
                            [np.asarray(p) for p in params])
    # Linear-actuator angles are O(1) rad; ideal actuators pass raw motor
    # positions through, so compare with both rtol and atol.
    np.testing.assert_allclose(np.asarray(out), ref, rtol=2e-3, atol=2e-3)

    print("KERNEL_OK")
</pallas_src>

<mosaic_0001>
module attributes {stable_mosaic.version = 11 : i64} {
  func.func @actuator_array_kernel(%arg0: i32, %arg1: i32, %arg2: memref<8x8xf32, #tpu.memory_space<vmem>>, %arg3: memref<8x128xf32, #tpu.memory_space<vmem>>, %arg4: memref<8x128xf32, #tpu.memory_space<vmem>>) attributes {dimension_semantics = [#tpu.dimension_semantics<parallel>, #tpu.dimension_semantics<parallel>], iteration_bounds = array<i64: 1, 2>, scalar_prefetch = 0 : i64, scratch_operands = 0 : i64, tpu.core_type = #tpu.core_type<tc>, window_params = [{transform_indices = @transform_0, window_bounds = array<i64: 8, 8>}, {transform_indices = @transform_1, window_bounds = array<i64: 8, 128>}, {transform_indices = @transform_2, window_bounds = array<i64: 8, 128>}]} {
    %c0 = arith.constant 0 : index
    %c0_0 = arith.constant 0 : index
    %0 = vector.load %arg3[%c0, %c0_0] : memref<8x128xf32, #tpu.memory_space<vmem>>, vector<8x128xf32>
    %c0_1 = arith.constant 0 : index
    %c0_2 = arith.constant 0 : index
    %1 = vector.load %arg2[%c0_1, %c0_2] : memref<8x8xf32, #tpu.memory_space<vmem>>, vector<8x8xf32>
    %2 = vector.extract_strided_slice %1 {offsets = [0, 0], sizes = [8, 1], strides = [1, 1]} : vector<8x8xf32> to vector<8x1xf32>
    %3 = vector.extract_strided_slice %1 {offsets = [0, 1], sizes = [8, 1], strides = [1, 1]} : vector<8x8xf32> to vector<8x1xf32>
    %4 = vector.extract_strided_slice %1 {offsets = [0, 2], sizes = [8, 1], strides = [1, 1]} : vector<8x8xf32> to vector<8x1xf32>
    %5 = vector.extract_strided_slice %1 {offsets = [0, 3], sizes = [8, 1], strides = [1, 1]} : vector<8x8xf32> to vector<8x1xf32>
    %6 = vector.extract_strided_slice %1 {offsets = [0, 4], sizes = [8, 1], strides = [1, 1]} : vector<8x8xf32> to vector<8x1xf32>
    %7 = vector.extract_strided_slice %1 {offsets = [0, 5], sizes = [8, 1], strides = [1, 1]} : vector<8x8xf32> to vector<8x1xf32>
    %8 = vector.broadcast %2 : vector<8x1xf32> to vector<8x128xf32>
    %9 = arith.mulf %0, %8 : vector<8x128xf32>
    %10 = vector.broadcast %3 : vector<8x1xf32> to vector<8x128xf32>
    %11 = arith.addf %9, %10 : vector<8x128xf32>
    %12 = arith.mulf %11, %11 : vector<8x128xf32>
    %13 = vector.broadcast %4 : vector<8x1xf32> to vector<8x128xf32>
    %14 = arith.subf %13, %12 : vector<8x128xf32>
    %cst = arith.constant -1.000000e+00 : f32
    %cst_3 = arith.constant 1.000000e+00 : f32
    %15 = vector.broadcast %cst : f32 to vector<8x128xf32>
    %16 = arith.maximumf %15, %14 : vector<8x128xf32>
    %17 = vector.broadcast %cst_3 : f32 to vector<8x128xf32>
    %18 = arith.minimumf %17, %16 : vector<8x128xf32>
    %19 = math.absf %18 : vector<8x128xf32>
    %cst_4 = arith.constant 1.000000e+00 : f32
    %20 = vector.broadcast %cst_4 : f32 to vector<8x128xf32>
    %21 = arith.subf %20, %19 : vector<8x128xf32>
    %cst_5 = arith.constant 0.000000e+00 : f32
    %22 = vector.broadcast %cst_5 : f32 to vector<8x128xf32>
    %23 = arith.maximumf %21, %22 : vector<8x128xf32>
    %24 = math.sqrt %23 : vector<8x128xf32>
    %cst_6 = arith.constant -1.872930e-02 : f32
    %25 = vector.broadcast %cst_6 : f32 to vector<8x128xf32>
    %26 = arith.mulf %19, %25 : vector<8x128xf32>
    %cst_7 = arith.constant 7.426100e-02 : f32
    %27 = vector.broadcast %cst_7 : f32 to vector<8x128xf32>
    %28 = arith.addf %27, %26 : vector<8x128xf32>
    %29 = arith.mulf %19, %28 : vector<8x128xf32>
    %cst_8 = arith.constant -0.212114394 : f32
    %30 = vector.broadcast %cst_8 : f32 to vector<8x128xf32>
    %31 = arith.addf %30, %29 : vector<8x128xf32>
    %32 = arith.mulf %19, %31 : vector<8x128xf32>
    %cst_9 = arith.constant 1.57072878 : f32
    %33 = vector.broadcast %cst_9 : f32 to vector<8x128xf32>
    %34 = arith.addf %33, %32 : vector<8x128xf32>
    %35 = arith.mulf %24, %34 : vector<8x128xf32>
    %cst_10 = arith.constant 0.000000e+00 : f32
    %36 = vector.broadcast %cst_10 : f32 to vector<8x128xf32>
    %37 = arith.cmpf oge, %18, %36 : vector<8x128xf32>
    %cst_11 = arith.constant 3.14159274 : f32
    %38 = vector.broadcast %cst_11 : f32 to vector<8x128xf32>
    %39 = arith.subf %38, %35 : vector<8x128xf32>
    %40 = arith.select %37, %35, %39 : vector<8x128xi1>, vector<8x128xf32>
    %41 = vector.broadcast %6 : vector<8x1xf32> to vector<8x128xf32>
    %42 = arith.mulf %41, %40 : vector<8x128xf32>
    %43 = vector.broadcast %5 : vector<8x1xf32> to vector<8x128xf32>
    %44 = arith.subf %43, %42 : vector<8x128xf32>
    %cst_12 = arith.constant 5.000000e-01 : f32
    %45 = vector.broadcast %cst_12 : f32 to vector<8x1xf32>
    %46 = arith.cmpf ogt, %7, %45 : vector<8x1xf32>
    %47 = vector.shape_cast %46 : vector<8x1xi1> to vector<8x1xi1>
    %48 = vector.broadcast %47 : vector<8x1xi1> to vector<8x128xi1>
    %49 = arith.select %48, %0, %44 : vector<8x128xi1>, vector<8x128xf32>
    %c0_13 = arith.constant 0 : index
    %c0_14 = arith.constant 0 : index
    %50 = vector.load %arg4[%c0_13, %c0_14] : memref<8x128xf32, #tpu.memory_space<vmem>>, vector<8x128xf32>
    tpu.vector_store %arg4[%c0_13, %c0_14], %49 {strides = array<i32>} : memref<8x128xf32, #tpu.memory_space<vmem>>, vector<8x128xf32>,
    return
  }
  func.func @transform_0(%arg0: i32, %arg1: i32) -> (i32, i32) {
    %c0_i32 = arith.constant 0 : i32
    %c0_i32_0 = arith.constant 0 : i32
    return %arg0, %c0_i32 : i32, i32
  }
  func.func @transform_1(%arg0: i32, %arg1: i32) -> (i32, i32) {
    %c0_i32 = arith.constant 0 : i32
    return %arg0, %arg1 : i32, i32
  }
  func.func @transform_2(%arg0: i32, %arg1: i32) -> (i32, i32) {
    %c0_i32 = arith.constant 0 : i32
    return %arg0, %arg1 : i32, i32
  }
}

</mosaic_0001>

<bundles_post_ra>
// kernel: tpu_custom_call.1
= control target key start
LH: loop header
LB: loop body
LE: loop exit
PB: predicated region body
PF: predicated region fallthrough
CT: control target
= control target key end

     0   :  { %7 = vsyncpa [#allocation3], 0  ;;  %s806_s0 = inlined_call_operand.hbm [shape: f32[8,8], index: 0, kind: input, shape index: {}]   ;;  %s807_s1 = inlined_call_operand.hbm [shape: f32[8,256], index: 1, kind: input, shape index: {}]   ;;  %s808_s2 = inlined_call_operand.hbm [shape: f32[8,256], index: 2, kind: output, shape index: {}]  }
   0x1   :  { %8 = vsyncpa [#allocation6], 0 }
   0x2   :  { %10 = vsyncpa [#allocation6 + $0x1], 0 }
   0x3   :  { %11 = vsyncpa [#allocation4], 0 }
   0x4   :  { %13 = vsyncpa [#allocation4 + $0x1], 0  ;;  %s653_s9 = smov 0   ;;  %s655_s10 = smov 0  }
   0x5   :  { %s657_s11 = smov 0   ;;  %s659_s12 = smov 0  }
   0x6   :  { %s661_s13 = smov 0   ;;  %s663_s14 = smov 0  }
   0x7 LB: > { %s379_s15 = sadd.s32 4294967295, %s629_s14   ;;  %s380_s16 = sadd.s32 4294967294, %s629_s14   ;;  %s629_s14 = sphi %s663_s14, %s19_s14   ;;  %s625_s13 = sphi %s661_s13, %s820_s13   ;;  %s621_s12 = sphi %s659_s12, %s819_s12   ;;  %s617_s11 = sphi %s657_s11, %s818_s11   ;;  %s613_s10 = sphi %s655_s10, %s817_s10   ;;  %s609_s9 = sphi %s653_s9, %s816_s9  }
   0x8   : > { %p79_p0 = scmp.ne.s32.totalorder %s613_s10, %s609_s9  ;;  %p687_p1 = scmp.eq.s32.totalorder %s379_s15, 0 }
   0x9   : > { %p691_p2 = scmp.eq.s32.totalorder %s379_s15, 1  ;;  %p111_p3 = scmp.eq.s32.totalorder %s380_s16, 1 }
   0xa   : > { %p697_p4 = por %p687_p1, %p79_p0  ;;  %p381_p5 = scmp.ge.s32.totalorder %s629_s14, 1 }
   0xb   : > { %p702_p6 = por %p111_p3, %p79_p0  ;;  %p118_p7 = scmp.lt.s32.totalorder %s629_s14, 3 }
   0xc   : > { %s132_s23 = sshll.u32 %s806_s0, 4  ;;  %p383_p9 = scmp.ge.s32.totalorder %s629_s14, 2  ;;  %s133_s23 = int_to_ptr.hbm [resolvable:$true] %s132_s23 }
   0xd   : > { %p710_p8 = pnand %p381_p5, %p118_p7  ;;  %s631_s25 = smov [#allocation2]  }
   0xe   : > { %s134_s26 = sshll.u32 %s631_s25, 4  ;;  %s28_s27 = sadd.s32 1, %s625_s13  ;;  %s135_s26 = int_to_ptr.vmem [resolvable:$true] %s134_s26 }
   0xf   : > { %p403_p10 = pneg %p710_p8  ;;  %p29_p12 = scmp.ge.s32.totalorder %s28_s27, 2 }
  0x10   : > { %s66_s28 = sadd.s32 1, %s617_s11  ;;  %p73_p13 = scmp.ne.s32.totalorder %s617_s11, %s613_s10 }
  0x11   : > { %p404_p11 = pnand %p403_p10, %p687_p1  ;;  %p74_p0 = scmp.eq.s32.totalorder %s629_s14, 0 }
  0x12   : > { %s822_s27 = smov (%p29_p12, %s28_s27), 0  ;;  %p732_p5 = por %p691_p2, %p73_p13 }
  0x13   : > { %406 = dma.hbm_to_vmem [thread:$0]  (!%p404_p11), %s133_s23, 128, %s135_s26, [#allocation3]  }
  0x14   : > { %p726_p3 = por %p74_p0, %p73_p13  ;;  %s62_s3 = ssub.s32 %s625_s13, %s822_s27 }
  0x15   : > { %p416_p7 = scmp.lt.s32.totalorder %s629_s14, 2  ;;  %p64_p10 = scmp.eq.s32.totalorder %s62_s3, 0 }
  0x16   : > { %s145_s4 = sand.u32 1, %s617_s11   ;;  %s385_s7 = sshll.u32 %s625_s13, 3 }
  0x17   : > { %s384_s5 = sshll.u32 %s145_s4, 3  ;;  %s155_s16 = scalar_lea.hbm %s807_s1, %s385_s7 }
  0x18   : > { %s741_s6 = scalar_select %p64_p10, %s617_s11, %s66_s28  }
  0x19   : > { %s149_s21 = scalar_lea.vmem [#allocation5], %s384_s5  ;;  %s157_s18 = sshll.u32 %s155_s16, 4  ;;  %s158_s18 = int_to_ptr.hbm [resolvable:$true] %s157_s18 }
  0x1a   : > { %s159_s22 = sshll.u32 %s149_s21, 4  ;;  %p408_p2 = pnand %p416_p7, %p726_p3  ;;  %s160_s22 = int_to_ptr.vmem [resolvable:$true] %s159_s22 }
  0x1b   : > { %s146_s23 = scalar_lea.sflag [#allocation6], %s145_s4  ;;  %168 = sbr.rel (%p710_p8) target bundleno = 211 (0xd3), region = 28 }
  0x1c   : > { %410 = dma.hbm_to_vmem [thread:$0]  (!%p408_p2), %s158_s18, 128, %s160_s22, %s146_s23  }
  0x20   : > { %596 = dma.done.wait (%p687_p1), [#allocation3], 128  }
  0x21   : > { %598 = vsyncadd (%p687_p1), [#allocation3], 4294967168  ;;  %s756_s25 = sand.u32 1, %s613_s10  }
  0x22   : > { %s388_s26 = sshll.u32 %s756_s25, 3  ;;  %s176_s28 = scalar_lea.sflag [#allocation6], %s756_s25 }
  0x23   : > { %s179_s29 = scalar_lea.vmem [#allocation5], %s388_s26 }
  0x24   : > { %600 = dma.done.wait (%p697_p4), %s176_s28, 128  }
  0x25   : > { %602 = vsyncadd (%p697_p4), %s176_s28, 4294967168  ;;  %v632_v0 = vmov 0   ;;  %v633_v1 = vmov 2   ;;  %v634_v2 = vmov 3   ;;  %v202_v3 = vld [vmem:[#allocation2] sm:$0xff]  ;;  %v635_v5 = vmov 1  }
  0x26   : > { %474 = vset.pattern.permute.xlu0 %v632_v0  ;;  %476 = vset.pattern.permute.xlu1 %v633_v1  ;;  %vm257_vm0 = vcmp.gt.f32.partialorder %v202_v3, 0.5  ;;  %v636_v6 = vmov 4   ;;  %v637_v7 = vmov 5   ;;  %v201_v9 = vld [vmem:[%s179_s29] sm:$0xff]  ;;  %s392_s17 = sshll.u32 %s621_s12, 3  ;;  %s200_s4 = scalar_lea.vmem [#allocation7], %s388_s26 }
  0x27   : > { %478 = vset.pattern.permute.xlu2 %v634_v2  ;;  %205 = vperm.xlu0 %474, %v202_v3   ;;  %v258_v4 = vsel %vm257_vm0, 1, %v632_v0  ;;  %s278_s3 = scalar_lea.hbm %s808_s2, %s392_s17  ;;  %s280_s5 = sshll.u32 %s200_s4, 4  ;;  %s281_s5 = int_to_ptr.vmem [resolvable:$true] %s280_s5 }
  0x28   : > { %216 = vperm.xlu1 %476, %v202_v3   ;;  %253 = vperm.xlu2 %478, %v202_v3   ;;  %s282_s7 = sshll.u32 %s278_s3, 4  ;;  %s266_s12 = scalar_lea.sflag [#allocation4], %s756_s25  ;;  %s283_s7 = int_to_ptr.hbm [resolvable:$true] %s282_s7 }
  0x29   : > { %s557_s8 = sshra.s32 %s283_s7, 4  ;;  %s563_s22 = scalar_lea.hbm %s808_s2, 16  ;;  %s558_s8 = int_to_ptr.hbm [resolvable:$true] %s557_s8 }
  0x2a   : > { %s559_s15 = scalar_lea.hbm %s558_s8, 8  ;;  %p564_p11 = scmp.lt.s32.totalorder %s558_s8, %s808_s2 }
  0x2b   : > { %p560_p1 = scmp.ne.s32.totalorder %s558_s8, %s559_s15  ;;  %p565_p12 = scmp.lt.s32.totalorder %s563_s22, %s559_s15 }
  0x2d   : > { %p561_p4 = pnand %p560_p1, %p732_p5  ;;  %p566_p13 = por %p565_p12, %p564_p11 }
  0x2f   : > { %475 = vset.pattern.permute.xlu0 %v635_v5  ;;  %p562_p8 = pneg %p561_p4 }
  0x30   : > { %477 = vset.pattern.permute.xlu1 %v636_v6  ;;  %210 = vperm.xlu0 %475, %v202_v3  }
  0x31   : > { %248 = vperm.xlu1 %477, %v202_v3   ;;  %479 = vset.pattern.permute.xlu2 %v637_v7  ;;  %p567_p0 = pnand %p566_p13, %p562_p8 }
  0x32   : > { %260 = vperm.xlu2 %479, %v258_v4  }
  0x38   : > { %480 = vset.pattern.permute.xlu0 %v637_v7 }
  0x82   : > { %v254_v29 = vpop.permute.xlu2 %253 }
  0x8c   : > { %v261_v40 = vpop.permute.xlu2 %260 }
  0x8d   : > { %vm262_vm4 = vcmp.eq.s32.totalorder %v261_v40, 1 }
  0x99   : > { %v206_v8 = vpop.permute.xlu0 %205 }
  0x9a   : > { %v208_v10 = vmul.f32 %v206_v8, %v201_v9  ;;  %v217_v13 = vpop.permute.xlu1 %216 }
  0xa2   : > { %v211_v11 = vpop.permute.xlu0 %210 }
  0xa3   : > { %v213_v12 = vadd.f32 %v211_v11, %v208_v10  ;;  %v249_v38 = vpop.permute.xlu1 %248 }
  0xa5   : > { %v214_v14 = vmul.f32 %v213_v12, %v213_v12 }
  0xa7   : > { %v219_v15 = vsub.f32 %v217_v13, %v214_v14 }
  0xa9   : > { %v390_v16 = vclamps-f32 %v219_v15, 1.0 }
  0xab   : > { %v222_v17 = vand.u32 2147483647, %v390_v16  ;;  %vm244_vm3 = vcmp.ge.f32.partialorder %v390_v16, 0.0 }
  0xad   : > { %v223_v18 = vsub.f32 1.0, %v222_v17  ;;  %v237_v20 = vmul.f32 -0.0187293, %v222_v17 }
  0xaf   : > { %v224_v19 = vmax.f32 %v223_v18, 0.0  ;;  %v238_v21 = vadd.f32 0.074261, %v237_v20 }
  0xb1   : > { %481 = vrsqrt.f32 %v224_v19  ;;  %v239_v24 = vmul.f32 %v238_v21, %v222_v17  ;;  %vm232_vm1 = vcmp.eq.f32.partialorder %v224_v19, inf  ;;  %v235_v33 = vand.u32 2147483648, %v224_v19 }
  0xb2   : > { %vm234_vm2 = vcmp.eq.f32.partialorder %v224_v19, 0.0 }
  0xb3   : > { %v240_v27 = vadd.f32 -0.2121144, %v239_v24 }
  0xb5   : > { %v241_v31 = vmul.f32 %v240_v27, %v222_v17 }
  0xb7   : > { %v482_v22 = vpop.eup %481  ;;  %v242_v35 = vadd.f32 1.5707288, %v241_v31 }
  0xb8   : > { %v226_v23 = vmul.f32 %v482_v22, %v224_v19 }
  0xba   : > { %v227_v25 = vmul.f32 %v482_v22, %v226_v23 }
  0xbc   : > { %v228_v26 = vmul.f32 0.5, %v227_v25 }
  0xbe   : > { %v229_v28 = vsub.f32 1.5, %v228_v26 }
  0xc0   : > { %v230_v30 = vmul.f32 %v482_v22, %v229_v28 }
  0xc2   : > { %v231_v32 = vmul.f32 %v230_v30, %v224_v19 }
  0xc4   : > { %v233_v34 = vsel %vm232_vm1, %v224_v19, %v231_v32 }
  0xc5   : > { %v236_v36 = vsel %vm234_vm2, %v235_v33, %v233_v34 }
  0xc6   : > { %v243_v37 = vmul.f32 %v242_v35, %v236_v36 }
  0xc8   : > { %v245_v39 = vsub.f32 3.1415927, %v243_v37 }
  0xca   : > { %v246_v41 = vsel %vm244_vm3, %v243_v37, %v245_v39 }
  0xcb   : > { %v251_v42 = vmul.f32 %v249_v38, %v246_v41 }
  0xcd   : > { %v256_v43 = vsub.f32 %v254_v29, %v251_v42 }
  0xcf   : > { %v263_v44 = vsel %vm262_vm4, %v201_v9, %v256_v43 }
  0xd0   : > { %264 = vst [vmem:[%s200_s4] sm:$0xff] %v263_v44 }
  0xd1   : > { %570 = shalt.err (!%p567_p0)
}
  0xd2   : > { %401 = dma.vmem_to_hbm [thread:$0]  (%p732_p5), %s281_s5, 128, %s283_s7, %s266_s12  }
  0xd3 PF: > { %s294_s25 = sand.u32 1, %s609_s9   ;;  %p412_p3 = pnand %p383_p9, %p702_p6 }
  0xd4   : > { %s295_s26 = scalar_lea.sflag [#allocation4], %s294_s25 }
  0xd5   : > { %p413_p7 = pneg %p412_p3 }
  0xd7   : > { %604 = dma.done.wait (%p413_p7), %s295_s26, 128  }
  0xd8   : > { %606 = vsyncadd (%p413_p7), %s295_s26, 4294967168  ;;  %s19_s14 = sadd.s32 1, %s629_s14   ;;  %s816_s9 = smov %s613_s10 }
  0xd9   : > { %p16_p10 = scmp.ge.s32.totalorder %s19_s14, 4   ;;  %s817_s10 = smov %s617_s11 }
  0xda   : > { %s818_s11 = smov %s741_s6  ;;  %s819_s12 = smov %s625_s13 }
  0xdb   : > { %s820_s13 = smov %s822_s27  ;;  %18 = sbr.rel (!%p16_p10) target bundleno = 7 (0x7), region = 79 }
  0xe0   :  { %301 = vsyncpa [#allocation3], 1 }
  0xe1   :  { %303 = vsyncpa [#allocation3 + $0x1], 1 }
  0xe2   :  { %304 = vsyncpa [#allocation6], 1 }
  0xe3   :  { %306 = vsyncpa [#allocation6 + $0x1], 1 }
  0xe4   :  { %307 = vsyncpa [#allocation4], 1 }
  0xe5   :  { %309 = vsyncpa [#allocation4 + $0x1], 1 }

</bundles_post_ra>
